<compile_context>
chip_gen: v5e
topology: v5e:2x2
jax: 0.10.0
libtpu: 0.0.40
codegen_flags: <defaults>
</compile_context>

<pallas_src>
import jax
import jax.numpy as jnp
from jax.experimental import pallas as pl
from jax.experimental.pallas import tpu as pltpu


def _transition_kernel(x_ref, scale_ref, shift_ref, w_ref, o_ref):
    """x_ref: (TM, 4*Cin) bf16 corner-packed slab; w_ref: (4*Cin, Cout) bf16.

    Fused BatchNorm(eval)+ReLU (0.25 pooling factor pre-folded into the affine,
    valid because ReLU is positively homogeneous), then ONE MXU matmul that
    performs both the 4-corner 2x2 sum (K dimension) and the 1x1 conv.
    """
    u = jnp.maximum(
        x_ref[...].astype(jnp.float32) * scale_ref[...] + shift_ref[...], 0.0)
    o_ref[...] = jnp.dot(u.astype(jnp.bfloat16), w_ref[...],
                         preferred_element_type=jnp.float32).astype(o_ref.dtype)


def _pick_tile_rows(M, Cin, Cout, vmem_budget_bytes=12 << 20, max_rows=1024):
    """Largest row tile whose double-buffered pipeline fits the VMEM budget."""
    # Per-row cost: double-buffered bf16 input slab + double-buffered f32 output.
    per_row = 2 * (4 * Cin * 2) + 2 * (Cout * 4)
    # Grid-resident operands (still double-buffered by the default pipeline):
    # bf16 (4*Cin, Cout) weights + f32 scale/shift rows.
    # TODO(synk): for very large Cin (>=1536) the tiled weight gets big; switch
    # to an in-kernel corner fold or an extra "arbitrary" K grid axis there.
    fixed = 2 * (4 * Cin * Cout * 2 + 2 * 4 * Cin * 4)
    avail = max(vmem_budget_bytes - fixed, 1 << 20)
    tm = min(max_rows, max(16, avail // per_row))
    # Prefer >= 4 grid steps so double-buffering engages and v7x's two
    # TensorCores both get work, whenever M is large enough.
    target = max(16, ((pl.cdiv(M, 4) + 15) // 16) * 16)
    tm = min(tm, target)
    tm = max(16, (tm // 16) * 16)        # bf16 sublane-packing granularity
    return M if tm >= M else tm


def transition_block_forward(x_nchw, gamma, beta, run_mean, run_var, conv_w,
                             drop_rate=0.0, eps=1e-5):
    """Forward of TransitionBlock (eval mode).

    x_nchw: (N, Cin, H, W) f32 -> (N, Cout, H//2, W//2) f32.
    """
    N, Cin, H, W = x_nchw.shape
    Cout = conv_w.shape[0]
    Ho, Wo = H // 2, W // 2                      # AvgPool2d(2,2) floors odd dims
    M = N * Ho * Wo
    f32 = jnp.float32

    # --- fold BatchNorm (eval) and the 2x2-mean 1/4 factor into one affine ----
    inv_std = 1.0 / jnp.sqrt(run_var.astype(f32) + eps)
    scale = gamma.astype(f32) * inv_std * 0.25
    shift = (beta.astype(f32) - run_mean.astype(f32) * gamma.astype(f32) * inv_std) * 0.25
    scale4 = jnp.tile(scale, 4).reshape(1, 4 * Cin)     # matches corner-major packing
    shift4 = jnp.tile(shift, 4).reshape(1, 4 * Cin)

    # 2x2-corner sum folded into the MXU K dim: w4[k*Cin + c, o] = conv_w[o, c].
    w2d = conv_w.reshape(Cout, Cin).T.astype(jnp.bfloat16)   # (Cin, Cout)
    w4 = jnp.tile(w2d, (4, 1))                                # (4*Cin, Cout)

    # --- single layout pass: NCHW -> (M, 4*Cin) bf16 slab ---------------------
    # Row r = (n*Ho + ho)*Wo + wo ; lane = k*Cin + c with corner k = h2*2 + w2.
    # bf16 output of this pass halves both its HBM write and the kernel's read.
    # TODO(synk): the biggest remaining win is consuming NCHW directly in-kernel
    # (no pre-pass / output-transpose round-trips); kept the robust slab
    # formulation here since the in-kernel strided 2x2 fold is layout-fragile.
    xe = x_nchw[:, :, :2 * Ho, :2 * Wo]
    x6 = jnp.transpose(
        xe.astype(f32).reshape(N, Cin, Ho, 2, Wo, 2),
        (0, 2, 4, 3, 5, 1)).reshape(M, 4 * Cin).astype(jnp.bfloat16)

    # TODO(synk): training-mode dropout (p=drop_rate) is not implemented; the
    # module is evaluated in inference mode where F.dropout is the identity.

    tm = _pick_tile_rows(M, Cin, Cout)
    grid = (pl.cdiv(M, tm),)

    cost = pl.CostEstimate(
        flops=2 * M * (4 * Cin) * Cout + 4 * M * (4 * Cin),
        transcendentals=0,
        bytes_accessed=(M * 4 * Cin * 2        # bf16 slab read
                        + M * Cout * 4         # f32 output write
                        + 4 * Cin * Cout * 2   # bf16 weights
                        + 2 * 4 * Cin * 4))    # f32 scale/shift

    out2d = pl.pallas_call(
        _transition_kernel,
        out_shape=jax.ShapeDtypeStruct((M, Cout), jnp.float32),
        grid=grid,
        in_specs=[
            pl.BlockSpec((tm, 4 * Cin), lambda i: (i, 0)),    # activation tile
            pl.BlockSpec((1, 4 * Cin), lambda i: (0, 0)),     # scale (resident)
            pl.BlockSpec((1, 4 * Cin), lambda i: (0, 0)),     # shift (resident)
            pl.BlockSpec((4 * Cin, Cout), lambda i: (0, 0)),  # weights (resident)
        ],
        out_specs=pl.BlockSpec((tm, Cout), lambda i: (i, 0)),
        compiler_params=pltpu.CompilerParams(
            dimension_semantics=("parallel",)),               # megacore-shardable
        cost_estimate=cost,
    )(x6, scale4, shift4, w4)

    # --- back to NCHW to match the PyTorch module's output layout -------------
    # TODO(synk): if the consumer accepts NHWC (or bf16), drop this transpose /
    # emit bf16 from the kernel to save another HBM round-trip.
    out = out2d.reshape(N, Ho, Wo, Cout)
    return jnp.transpose(out, (0, 3, 1, 2))                   # (N, Cout, Ho, Wo)


def _reference_forward(x, gamma, beta, run_mean, run_var, conv_w, eps=1e-5):
    """Pure-JAX f32 reference matching the PyTorch module (eval mode)."""
    bn = (x - run_mean[None, :, None, None]) / jnp.sqrt(
        run_var[None, :, None, None] + eps)
    bn = bn * gamma[None, :, None, None] + beta[None, :, None, None]
    act = jnp.maximum(bn, 0.0)
    w2d = conv_w.reshape(conv_w.shape[0], conv_w.shape[1])    # (Cout, Cin)
    conv = jnp.einsum('nchw,oc->nohw', act, w2d)
    N, Co, H, W = conv.shape
    pooled = conv[:, :, :2 * (H // 2), :2 * (W // 2)]
    pooled = pooled.reshape(N, Co, H // 2, 2, W // 2, 2).mean(axis=(3, 5))
    return pooled


if __name__ == "__main__":
    key = jax.random.PRNGKey(0)
    k_x, k_g, k_b, k_m, k_v, k_w = jax.random.split(key, 6)

    # NOTE: toy sizes (Cin=8, Cout=4) under-fill lanes; real DenseNet transition
    # layers (Cin, Cout >= 128) are lane-dense -- do not benchmark at this size.
    N, Cin, H, W = 2, 8, 16, 16          # in_planes = 8
    Cout = 4                             # out_plains = 4 (DenseNet-style halving)
    drop_rate = 0.2                      # >0, identity at inference time

    x = jax.random.normal(k_x, (N, Cin, H, W), dtype=jnp.float32)
    gamma = 1.0 + 0.1 * jax.random.normal(k_g, (Cin,), dtype=jnp.float32)
    beta = 0.1 * jax.random.normal(k_b, (Cin,), dtype=jnp.float32)
    run_mean = 0.1 * jax.random.normal(k_m, (Cin,), dtype=jnp.float32)
    run_var = 0.5 + jnp.abs(jax.random.normal(k_v, (Cin,), dtype=jnp.float32))
    conv_w = jax.random.normal(k_w, (Cout, Cin, 1, 1), dtype=jnp.float32) / jnp.sqrt(Cin)

    out = transition_block_forward(x, gamma, beta, run_mean, run_var, conv_w,
                                   drop_rate=drop_rate)
    out = jax.block_until_ready(out)

    ref = _reference_forward(x, gamma, beta, run_mean, run_var, conv_w)
    assert out.shape == (N, Cout, H // 2, W // 2), out.shape
    # bf16 slab + bf16 MXU operands (f32 accumulation) -> loosened tolerance.
    assert jnp.allclose(out, ref, atol=3e-2, rtol=3e-2), \
        float(jnp.max(jnp.abs(out - ref)))

    print("KERNEL_OK")
</pallas_src>

<mosaic_0001>
module attributes {stable_mosaic.version = 11 : i64} {
  func.func @_transition_kernel(%arg0: i32, %arg1: memref<32x32xbf16, #tpu.memory_space<vmem>>, %arg2: memref<1x32xf32, #tpu.memory_space<vmem>>, %arg3: memref<1x32xf32, #tpu.memory_space<vmem>>, %arg4: memref<32x4xbf16, #tpu.memory_space<vmem>>, %arg5: memref<32x4xf32, #tpu.memory_space<vmem>>) attributes {dimension_semantics = [#tpu.dimension_semantics<parallel>], iteration_bounds = array<i64: 4>, scalar_prefetch = 0 : i64, scratch_operands = 0 : i64, tpu.core_type = #tpu.core_type<tc>, window_params = [{transform_indices = @transform_0, window_bounds = array<i64: 32, 32>}, {pipeline_mode = #tpu.pipeline_mode<synchronous>, transform_indices = @transform_1, window_bounds = array<i64: 1, 32>}, {pipeline_mode = #tpu.pipeline_mode<synchronous>, transform_indices = @transform_2, window_bounds = array<i64: 1, 32>}, {pipeline_mode = #tpu.pipeline_mode<synchronous>, transform_indices = @transform_3, window_bounds = array<i64: 32, 4>}, {transform_indices = @transform_4, window_bounds = array<i64: 32, 4>}]} {
    %c0 = arith.constant 0 : index
    %c0_0 = arith.constant 0 : index
    %0 = vector.load %arg1[%c0, %c0_0] : memref<32x32xbf16, #tpu.memory_space<vmem>>, vector<32x32xbf16>
    %1 = arith.extf %0 : vector<32x32xbf16> to vector<32x32xf32>
    %c0_1 = arith.constant 0 : index
    %c0_2 = arith.constant 0 : index
    %2 = vector.load %arg2[%c0_1, %c0_2] : memref<1x32xf32, #tpu.memory_space<vmem>>, vector<1x32xf32>
    %3 = vector.broadcast %2 : vector<1x32xf32> to vector<32x32xf32>
    %4 = arith.mulf %1, %3 : vector<32x32xf32>
    %c0_3 = arith.constant 0 : index
    %c0_4 = arith.constant 0 : index
    %5 = vector.load %arg3[%c0_3, %c0_4] : memref<1x32xf32, #tpu.memory_space<vmem>>, vector<1x32xf32>
    %6 = vector.broadcast %5 : vector<1x32xf32> to vector<32x32xf32>
    %7 = arith.addf %4, %6 : vector<32x32xf32>
    %cst = arith.constant 0.000000e+00 : f32
    %8 = vector.broadcast %cst : f32 to vector<32x32xf32>
    %9 = arith.maximumf %7, %8 : vector<32x32xf32>
    %10 = arith.truncf %9 : vector<32x32xf32> to vector<32x32xbf16>
    %c0_5 = arith.constant 0 : index
    %c0_6 = arith.constant 0 : index
    %11 = vector.load %arg4[%c0_5, %c0_6] : memref<32x4xbf16, #tpu.memory_space<vmem>>, vector<32x4xbf16>
    %cst_7 = arith.constant dense<0.000000e+00> : vector<32x4xf32>
    %12 = tpu.matmul %10, %11, %cst_7 {dimension_numbers = #tpu.dot_dimension_numbers<[1], [0], [0], [1], [0, 0, 1, 1], [], []>} : vector<32x32xbf16>, vector<32x4xbf16>, vector<32x4xf32> -> vector<32x4xf32>
    %c0_8 = arith.constant 0 : index
    %c0_9 = arith.constant 0 : index
    %13 = vector.load %arg5[%c0_8, %c0_9] : memref<32x4xf32, #tpu.memory_space<vmem>>, vector<32x4xf32>
    tpu.vector_store %arg5[%c0_8, %c0_9], %12 {strides = array<i32>} : memref<32x4xf32, #tpu.memory_space<vmem>>, vector<32x4xf32>,
    return
  }
  func.func @transform_0(%arg0: i32) -> (i32, i32) {
    %c0_i32 = arith.constant 0 : i32
    %c0_i32_0 = arith.constant 0 : i32
    return %arg0, %c0_i32 : i32, i32
  }
  func.func @transform_1(%arg0: i32) -> (i32, i32) {
    %c0_i32 = arith.constant 0 : i32
    %c0_i32_0 = arith.constant 0 : i32
    %c0_i32_1 = arith.constant 0 : i32
    return %c0_i32, %c0_i32_0 : i32, i32
  }
  func.func @transform_2(%arg0: i32) -> (i32, i32) {
    %c0_i32 = arith.constant 0 : i32
    %c0_i32_0 = arith.constant 0 : i32
    %c0_i32_1 = arith.constant 0 : i32
    return %c0_i32, %c0_i32_0 : i32, i32
  }
  func.func @transform_3(%arg0: i32) -> (i32, i32) {
    %c0_i32 = arith.constant 0 : i32
    %c0_i32_0 = arith.constant 0 : i32
    %c0_i32_1 = arith.constant 0 : i32
    return %c0_i32, %c0_i32_0 : i32, i32
  }
  func.func @transform_4(%arg0: i32) -> (i32, i32) {
    %c0_i32 = arith.constant 0 : i32
    %c0_i32_0 = arith.constant 0 : i32
    return %arg0, %c0_i32 : i32, i32
  }
}

</mosaic_0001>

<bundles_post_ra>
// kernel: tpu_custom_call.1
= control target key start
LH: loop header
LB: loop body
LE: loop exit
PB: predicated region body
PF: predicated region fallthrough
CT: control target
= control target key end

     0   :  { %s412_s15 = smov 0   ;;  %s445_s0 = inlined_call_operand.vmem [shape: bf16[128,32], index: 0, kind: input, shape index: {}]   ;;  %s446_s1 = inlined_call_operand.vmem [shape: f32[1,32], index: 1, kind: input, shape index: {}]   ;;  %s447_s2 = inlined_call_operand.vmem [shape: f32[1,32], index: 2, kind: input, shape index: {}]   ;;  %s448_s3 = inlined_call_operand.vmem [shape: bf16[32,4], index: 3, kind: input, shape index: {}]   ;;  %s449_s4 = inlined_call_operand.vmem [shape: f32[128,4], index: 4, kind: output, shape index: {}]  }
   0x1 LB: > { %s335_s16 = sadd.s32 4294967295, %s385_s15   ;;  %p339_p0 = scmp.ge.s32.totalorder %s385_s15, 1  ;;  %s385_s15 = sphi %s412_s15, %s14_s15  }
   0x2   : > { %p163_p1 = scmp.lt.s32.totalorder %s385_s15, 5 }
   0x4   : > { %p164_p2 = pnand %p339_p0, %p163_p1 }
   0x5   : > { %s340_s19 = sshll.u32 (!%p164_p2), %s335_s16, 2 }
   0x6   : > { %167 = sbr.rel (%p164_p2) target bundleno = 161 (0xa1), region = 36  ;;  %p190_p3 = scmp.lt.s32.totalorder (!%p164_p2), %s340_s19, 15 }
   0xb   : > { %v357_v0 = vld [vmem:[%s448_s3 + $0x8] sm:$0xff]  ;;  %v356_v1 = vld [vmem:[%s448_s3] sm:$0xff]  ;;  %s451_s19 = smov (!%p190_p3, %s340_s19), 15  ;;  %vm248_vm0 = vcmask 261120   ;;  %vm274_vm1 = vcmask 31744  }
   0xc   : > { %261 = vmatpush.bf16.msra.mxu0 %v357_v0  ;;  %367 = vmatpush.bf16.msra.mxu1 %v357_v0  ;;  %s341_s22 = sshll.u32 %s451_s19, 2  ;;  %v377_v2 = vld [vmem:[%s446_s1] ss:$0 sm:$0xff]  ;;  %s343_s30 = sshll.u32 %s451_s19, 3 }
   0xd   : > { %s193_s25 = scalar_lea.vmem %s445_s0, %s341_s22  ;;  %v378_v7 = vld [vmem:[%s447_s2] ss:$0 sm:$0xff]  ;;  %s199_s7 = scalar_lea.vmem %s449_s4, %s343_s30 }
   0xe   : > { %v359_v3 = vld [vmem:[%s193_s25] sm:$0xff]   ;;  %v366_v4 = vld [vmem:[%s193_s25 + $0x8] sm:$0xff]  }
   0xf   : > { %v360_v5 = vunpack.c.l.bf16 %v359_v3  ;;  %v361_v6 = vunpack.c.h.bf16 %v359_v3  ;;  %v364_v8 = vunpack.c.l.bf16 %v366_v4  ;;  %v365_v9 = vunpack.c.h.bf16 %v366_v4 }
  0x10   : > { %262 = vmatpush.bf16.msra.mxu0 %v356_v1  ;;  %368 = vmatpush.bf16.msra.mxu1 %v356_v1 }
  0x11   : > { %v214_v10 = vmul.f32 %v377_v2, %v360_v5  ;;  %v215_v11 = vmul.f32 %v377_v2, %v361_v6  ;;  %v216_v12 = vmul.f32 %v377_v2, %v364_v8  ;;  %v217_v13 = vmul.f32 %v377_v2, %v365_v9 }
  0x13   : > { %v222_v14 = vadd.f32 %v378_v7, %v214_v10  ;;  %v223_v15 = vadd.f32 %v378_v7, %v215_v11  ;;  %v224_v16 = vadd.f32 %v378_v7, %v216_v12  ;;  %v225_v17 = vadd.f32 %v378_v7, %v217_v13 }
  0x15   : > { %v226_v18 = vmax.f32 %v222_v14, 0.0  ;;  %v227_v19 = vmax.f32 %v223_v15, 0.0  ;;  %v228_v20 = vmax.f32 %v224_v16, 0.0  ;;  %v229_v21 = vmax.f32 %v225_v17, 0.0 }
  0x17   : > { %v230_v22 = vpack.c.bf16 %v227_v19, %v226_v18  ;;  %v231_v23 = vpack.c.bf16 %v229_v21, %v228_v20 }
  0x19   : > { %352 = vmatmul.msk.bf16.vlgmr.msra.gmra.mxu0 %vm248_vm0, %v230_v22  ;;  %353 = vmatmul.msk.bf16.vlgmr.msra.gmra.mxu1 %vm248_vm0, %v231_v23 }
  0x96   : > { %v264_v24 = vpop.f32.mrf.mxu0  ;;  %v269_v25 = vpop.f32.mrf.mxu1 }
  0x97   : > { %275 = vst.msk [vmem:[%s199_s7] sm:$0xff] %vm274_vm1, %v264_v24 }
  0x98   : > { %277 = vst.msk [vmem:[%s199_s7 + $0x10] sm:$0xff] %vm274_vm1, %v269_v25 }
  0x9e   : > { %v266_v26 = vpop.f32.mrf.mxu0  ;;  %v271_v27 = vpop.f32.mrf.mxu1 }
  0x9f   : > { %276 = vst.msk [vmem:[%s199_s7 + $0x8] sm:$0xff] %vm274_vm1, %v266_v26 }
  0xa0   : > { %278 = vst.msk [vmem:[%s199_s7 + $0x18] sm:$0xff] %vm274_vm1, %v271_v27 }
  0xa1 PF: > { %s14_s15 = sadd.s32 1, %s385_s15  }
  0xa2   : > { %p11_p4 = scmp.ge.s32.totalorder %s14_s15, 6  }
  0xa4   :  { %13 = sbr.rel (!%p11_p4) target bundleno = 1 (0x1), region = 66 }

</bundles_post_ra>
